<compile_context>
chip_gen: v5e
topology: v5e:2x2
jax: 0.10.0
libtpu: 0.0.40
codegen_flags: <defaults>
</compile_context>

<pallas_src>
import jax
import jax.numpy as jnp
from jax.experimental import pallas as pl
from jax.experimental.pallas import tpu as pltpu

INPUT_DIM = 1
OUTPUT_DIM = 1

LANES = 128      # vreg lane width
SUBLANES = 8     # vreg sublane count (f32)


def linear1x1_kernel(w_ref, b_ref, x_ref, o_ref):
    # w_ref, b_ref: (1, 1) f32 scalars in SMEM
    # x_ref, o_ref: (block_rows, 128) tiles in VMEM
    w = w_ref[0, 0]
    b = b_ref[0, 0]
    # Pure VPU scalar-broadcast FMA; compute in f32, cast back to out dtype.
    o_ref[...] = (x_ref[...].astype(jnp.float32) * w + b).astype(o_ref.dtype)


def linear_forward(x, weight, bias, *, block_rows=2048):
    """out = x @ weight.T + bias  (PyTorch nn.Linear(1, 1) semantics)."""
    batch, in_dim = x.shape
    out_dim = weight.shape[0]
    assert in_dim == INPUT_DIM and out_dim == OUTPUT_DIM

    n = batch * in_dim
    x_flat = x.reshape(-1)

    # Lane-dense repack: pad to (rows, 128) with rows a multiple of the block.
    rows = max(pl.cdiv(n, LANES), SUBLANES)
    rows = ((rows + SUBLANES - 1) // SUBLANES) * SUBLANES
    brows = min(block_rows, rows)
    brows = ((brows + SUBLANES - 1) // SUBLANES) * SUBLANES
    rows = ((rows + brows - 1) // brows) * brows
    padded = rows * LANES

    x2 = jnp.pad(x_flat, (0, padded - n)).reshape(rows, LANES)
    w_s = weight.reshape(1, 1).astype(jnp.float32)
    b_s = bias.reshape(1, 1).astype(jnp.float32)

    grid = (rows // brows,)

    out2 = pl.pallas_call(
        linear1x1_kernel,
        out_shape=jax.ShapeDtypeStruct((rows, LANES), x.dtype),
        grid=grid,
        in_specs=[
            pl.BlockSpec(memory_space=pltpu.MemorySpace.SMEM),   # weight scalar
            pl.BlockSpec(memory_space=pltpu.MemorySpace.SMEM),   # bias scalar
            pl.BlockSpec((brows, LANES), lambda i: (i, 0)),      # x tile
        ],
        out_specs=pl.BlockSpec((brows, LANES), lambda i: (i, 0)),
        compiler_params=pltpu.CompilerParams(
            dimension_semantics=("parallel",),
        ),
    )(w_s, b_s, x2)

    return out2.reshape(-1)[:n].reshape(batch, out_dim)


if __name__ == "__main__":
    key = jax.random.PRNGKey(0)
    k_x, k_w, k_b = jax.random.split(key, 3)

    # Deterministic PyTorch-style init: U(-1/sqrt(fan_in), 1/sqrt(fan_in)).
    bound = 1.0 / (INPUT_DIM ** 0.5)
    weight = jax.random.uniform(
        k_w, (OUTPUT_DIM, INPUT_DIM), jnp.float32, minval=-bound, maxval=bound
    )
    bias = jax.random.uniform(
        k_b, (OUTPUT_DIM,), jnp.float32, minval=-bound, maxval=bound
    )

    # Small example batch, shape (batch, input_dim) as the forward implies.
    batch = 8
    x = jax.random.normal(k_x, (batch, INPUT_DIM), jnp.float32)

    out = jax.block_until_ready(linear_forward(x, weight, bias))

    # Reference check in plain JAX.
    ref = x @ weight.T + bias
    assert out.shape == (batch, OUTPUT_DIM)
    assert jnp.allclose(out, ref, atol=1e-5, rtol=1e-5)

    print("KERNEL_OK")
</pallas_src>

<mosaic_0001>
module attributes {stable_mosaic.version = 11 : i64} {
  func.func @linear1x1_kernel(%arg0: i32, %arg1: memref<1x1xf32, #tpu.memory_space<smem>>, %arg2: memref<1x1xf32, #tpu.memory_space<smem>>, %arg3: memref<8x128xf32, #tpu.memory_space<vmem>>, %arg4: memref<8x128xf32, #tpu.memory_space<vmem>>) attributes {dimension_semantics = [#tpu.dimension_semantics<parallel>], iteration_bounds = array<i64: 1>, scalar_prefetch = 0 : i64, scratch_operands = 0 : i64, tpu.core_type = #tpu.core_type<tc>, window_params = [{transform_indices = @transform_0, window_bounds = array<i64: 1, 1>}, {transform_indices = @transform_1, window_bounds = array<i64: 1, 1>}, {transform_indices = @transform_2, window_bounds = array<i64: 8, 128>}, {transform_indices = @transform_3, window_bounds = array<i64: 8, 128>}]} {
    %c0 = arith.constant 0 : index
    %c0_0 = arith.constant 0 : index
    %0 = memref.load %arg1[%c0, %c0_0] : memref<1x1xf32, #tpu.memory_space<smem>>
    %c0_1 = arith.constant 0 : index
    %c0_2 = arith.constant 0 : index
    %1 = memref.load %arg2[%c0_1, %c0_2] : memref<1x1xf32, #tpu.memory_space<smem>>
    %c0_3 = arith.constant 0 : index
    %c0_4 = arith.constant 0 : index
    %2 = vector.load %arg3[%c0_3, %c0_4] : memref<8x128xf32, #tpu.memory_space<vmem>>, vector<8x128xf32>
    %3 = vector.broadcast %0 : f32 to vector<8x128xf32>
    %4 = arith.mulf %2, %3 : vector<8x128xf32>
    %5 = vector.broadcast %1 : f32 to vector<8x128xf32>
    %6 = arith.addf %4, %5 : vector<8x128xf32>
    %c0_5 = arith.constant 0 : index
    %c0_6 = arith.constant 0 : index
    %7 = vector.load %arg4[%c0_5, %c0_6] : memref<8x128xf32, #tpu.memory_space<vmem>>, vector<8x128xf32>
    tpu.vector_store %arg4[%c0_5, %c0_6], %6 {strides = array<i32>} : memref<8x128xf32, #tpu.memory_space<vmem>>, vector<8x128xf32>,
    return
  }
  func.func @transform_0(%arg0: i32) -> (i32, i32) {
    %c0_i32 = arith.constant 0 : i32
    %c0_i32_0 = arith.constant 0 : i32
    %c0_i32_1 = arith.constant 0 : i32
    return %c0_i32, %c0_i32_0 : i32, i32
  }
  func.func @transform_1(%arg0: i32) -> (i32, i32) {
    %c0_i32 = arith.constant 0 : i32
    %c0_i32_0 = arith.constant 0 : i32
    %c0_i32_1 = arith.constant 0 : i32
    return %c0_i32, %c0_i32_0 : i32, i32
  }
  func.func @transform_2(%arg0: i32) -> (i32, i32) {
    %c0_i32 = arith.constant 0 : i32
    %c0_i32_0 = arith.constant 0 : i32
    return %arg0, %c0_i32 : i32, i32
  }
  func.func @transform_3(%arg0: i32) -> (i32, i32) {
    %c0_i32 = arith.constant 0 : i32
    %c0_i32_0 = arith.constant 0 : i32
    return %arg0, %c0_i32 : i32, i32
  }
}

</mosaic_0001>

<bundles_post_ra>
// kernel: tpu_custom_call.1
= control target key start
LH: loop header
LB: loop body
LE: loop exit
PB: predicated region body
PF: predicated region fallthrough
CT: control target
= control target key end

     0   :  { %10 = vsyncpa [#allocation5], 0  ;;  %s144_s0 = inlined_call_operand.<no memory space> [shape: f32[1,1], index: 0, kind: input, shape index: {}]   ;;  %s145_s1 = inlined_call_operand.<no memory space> [shape: f32[1,1], index: 1, kind: input, shape index: {}]   ;;  %s146_s2 = inlined_call_operand.hbm [shape: f32[8,128], index: 2, kind: input, shape index: {}]   ;;  %s147_s3 = inlined_call_operand.hbm [shape: f32[8,128], index: 3, kind: output, shape index: {}]  }
   0x1   :  { %11 = vsyncpa [#allocation6], 0  ;;  %s21_s14 = sshll.u32 %s146_s2, 4  ;;  %s110_s15 = smov [#allocation4]   ;;  %s22_s14 = int_to_ptr.hbm [resolvable:$true] %s21_s14 }
   0x2   :  { %s23_s16 = sshll.u32 %s110_s15, 4  ;;  %s24_s16 = int_to_ptr.vmem [resolvable:$true] %s23_s16 }
   0x3   :  { %26 = dma.hbm_to_vmem [thread:$0]  %s22_s14, 128, %s24_s16, [#allocation5]  }
   0x4   :  { %106 = dma.done.wait [#allocation5], 128  }
   0x5   :  { %107 = vsyncadd [#allocation5], 4294967168  ;;  %v34_v0 = vstv %s144_s0  ;;  %v33_v1 = vld [vmem:[#allocation4] sm:$0xff]  ;;  %v36_v2 = vstv %s145_s1  ;;  %s111_s21 = smov [#allocation7]   ;;  %s46_s24 = sshll.u32 %s147_s3, 4  ;;  %s47_s24 = int_to_ptr.hbm [resolvable:$true] %s46_s24 }
   0x6   :  { %s44_s22 = sshll.u32 %s111_s21, 4  ;;  %v35_v3 = vmul.f32 %v34_v0, %v33_v1  ;;  %s45_s22 = int_to_ptr.vmem [resolvable:$true] %s44_s22 }
   0x8   :  { %v37_v4 = vadd.f32 %v36_v2, %v35_v3 }
   0xa   :  { %38 = vst [vmem:[#allocation7] sm:$0xff] %v37_v4 }
   0xb   :  { %49 = dma.vmem_to_hbm [thread:$0]  %s45_s22, 128, %s47_s24, [#allocation6]  }
   0xc   :  { %108 = dma.done.wait [#allocation6], 128  }
   0xd   :  { %109 = vsyncadd [#allocation6], 4294967168 }
   0xe   :  { %54 = vsyncpa [#allocation5], 1 }
   0xf   :  { %55 = vsyncpa [#allocation6], 1 }

</bundles_post_ra>
